<compile_context>
chip_gen: v7x
topology: tpu7x:2x2x1
jax: 0.10.0
libtpu: 0.0.40
codegen_flags: <defaults>
</compile_context>

<pallas_src>
import jax
import jax.numpy as jnp
from jax.experimental import pallas as pl
from jax.experimental.pallas import tpu as pltpu

_GATHER_DEPTH = 8  # DMA gather pipeline depth (one sublane group per wave)


def _round_up(x, m):
    return ((x + m - 1) // m) * m


def cls_loss_pallas(outputs, predicted_score, index, *, block_b=128):
    """outputs: [B, C] f32, predicted_score: [N, C] f32, index: [B] int -> scalar f32."""
    B, C = outputs.shape
    N = predicted_score.shape[0]

    # Clamp indices: OOB DMA on TPU is unchecked, so guard here (cheap, in JAX).
    idx = jnp.clip(index.astype(jnp.int32), 0, N - 1)

    # Batch tile: multiple of 8 (sublanes) and of the gather depth.
    tb = min(_round_up(block_b, _GATHER_DEPTH), _round_up(B, _GATHER_DEPTH))
    b_pad = _round_up(B, tb)
    grid = (b_pad // tb,)

    logits = outputs.astype(jnp.float32)
    if b_pad != B:
        logits = jnp.pad(logits, ((0, b_pad - B), (0, 0)))
        idx = jnp.pad(idx, (0, b_pad - B))

    def kernel(idx_ref, logits_ref, scores_hbm, loss_ref, gbuf, sem, acc_ref):
        pid = pl.program_id(0)
        base = pid * tb

        @pl.when(pid == 0)
        def _init():
            acc_ref[...] = jnp.zeros_like(acc_ref)

        # ---- DMA row gather: predicted_score[index[base:base+tb], :] -> gbuf ----
        # Issued in waves of _GATHER_DEPTH copies on a small semaphore array so
        # row fetches within a wave overlap.
        for w in range(tb // _GATHER_DEPTH):
            for j in range(_GATHER_DEPTH):
                r = w * _GATHER_DEPTH + j
                src = idx_ref[base + r]                      # SMEM scalar read
                pltpu.make_async_copy(
                    scores_hbm.at[pl.ds(src, 1), :],
                    gbuf.at[pl.ds(r, 1), :],
                    sem.at[j],
                ).start()
            for j in range(_GATHER_DEPTH):
                r = w * _GATHER_DEPTH + j
                pltpu.make_async_copy(
                    scores_hbm.at[pl.ds(0, 1), :],
                    gbuf.at[pl.ds(r, 1), :],
                    sem.at[j],
                ).wait()

        # ---- fused log-softmax + weighted reduction (no [tb, C] logsm temp) ----
        x = logits_ref[...]                                   # (tb, C) f32
        g = gbuf[...].astype(jnp.float32)                     # (tb, C)

        m = jnp.max(x, axis=1, keepdims=True)                 # (tb, 1)
        z = x - m
        lse = jnp.log(jnp.sum(jnp.exp(z), axis=1, keepdims=True))  # (tb, 1)

        s = jnp.sum(g * z, axis=1, keepdims=True)             # (tb, 1)
        g1 = jnp.sum(g, axis=1, keepdims=True)                # (tb, 1)
        row = s - g1 * lse                                    # sum_c(g * logsm) per row

        # Zero out padded batch rows.
        row_ids = base + jax.lax.broadcasted_iota(jnp.int32, row.shape, 0)
        row = jnp.where(row_ids < B, row, 0.0)

        acc_ref[...] += jnp.sum(row, keepdims=True)           # running sum, (1, 1)
        loss_ref[...] = (-acc_ref[...] / jnp.float32(B)).astype(loss_ref.dtype)

    out = pl.pallas_call(
        kernel,
        out_shape=jax.ShapeDtypeStruct((1, 1), jnp.float32),
        grid_spec=pltpu.PrefetchScalarGridSpec(
            num_scalar_prefetch=1,                            # index -> SMEM
            grid=grid,
            in_specs=[
                pl.BlockSpec((tb, C), lambda i, idx: (i, 0)),  # logits tile (pipelined)
                pl.BlockSpec(memory_space=pl.ANY),             # predicted_score stays in HBM
            ],
            out_specs=pl.BlockSpec((1, 1), lambda i, idx: (0, 0)),
            scratch_shapes=[
                pltpu.VMEM((tb, C), predicted_score.dtype),    # gathered score rows
                pltpu.SemaphoreType.DMA((_GATHER_DEPTH,)),
                pltpu.VMEM((1, 1), jnp.float32),               # scalar accumulator
            ],
        ),
        compiler_params=pltpu.CompilerParams(
            dimension_semantics=("arbitrary",),  # accumulator carried across batch tiles
        ),
    )(idx, logits, predicted_score)
    return out[0, 0]


def cls_loss_ref(outputs, predicted_score, index):
    """Pure-JAX reference mirroring the PyTorch forward."""
    logsm = jax.nn.log_softmax(outputs.astype(jnp.float32), axis=1)
    final = predicted_score[index, :] * logsm
    return -jnp.mean(jnp.sum(final, axis=1))


if __name__ == "__main__":
    key = jax.random.PRNGKey(0)
    k1, k2, k3, k4, k5 = jax.random.split(key, 5)

    # Deterministic "module parameter": predicted_score rows are valid distributions.
    B, C, N = 8, 32, 16
    predicted_score = jax.nn.softmax(jax.random.normal(k1, (N, C), jnp.float32), axis=1)

    # Case 1: small batch, single tile.
    outputs = jax.random.normal(k2, (B, C), jnp.float32)
    index = jax.random.randint(k3, (B,), 0, N, jnp.int32)
    loss = jax.block_until_ready(cls_loss_pallas(outputs, predicted_score, index))
    ref = cls_loss_ref(outputs, predicted_score, index)
    assert jnp.allclose(loss, ref, rtol=1e-5, atol=1e-5), (loss, ref)

    # Case 2: multi-tile grid with batch padding (B not a multiple of the tile).
    B2 = 20
    outputs2 = jax.random.normal(k4, (B2, C), jnp.float32)
    index2 = jax.random.randint(k5, (B2,), 0, N, jnp.int32)
    loss2 = jax.block_until_ready(
        cls_loss_pallas(outputs2, predicted_score, index2, block_b=8))
    ref2 = cls_loss_ref(outputs2, predicted_score, index2)
    assert jnp.allclose(loss2, ref2, rtol=1e-5, atol=1e-5), (loss2, ref2)

    print("KERNEL_OK")
</pallas_src>

<mosaic_0001>
module attributes {stable_mosaic.version = 11 : i64} {
  func.func @kernel(%arg0: i32, %arg1: memref<8xi32, #tpu.memory_space<smem>>, %arg2: memref<8x32xf32, #tpu.memory_space<vmem>>, %arg3: memref<16x32xf32, #tpu.memory_space<any>>, %arg4: memref<1x1xf32, #tpu.memory_space<vmem>>, %arg5: memref<8x32xf32, #tpu.memory_space<vmem>>, %arg6: memref<8x!tpu.dma_semaphore, #tpu.memory_space<semaphore_mem>>, %arg7: memref<1x1xf32, #tpu.memory_space<vmem>>) attributes {dimension_semantics = [#tpu.dimension_semantics<arbitrary>], iteration_bounds = array<i64: 1>, scalar_prefetch = 1 : i64, scratch_operands = 3 : i64, tpu.core_type = #tpu.core_type<tc>, window_params = [{transform_indices = @transform_0, window_bounds = array<i64: 8, 32>}, {}, {pipeline_mode = #tpu.pipeline_mode<synchronous>, transform_indices = @transform_2, window_bounds = array<i64: 1, 1>}]} {
    %c8_i32 = arith.constant 8 : i32
    %0 = arith.muli %arg0, %c8_i32 : i32
    %c0_i32 = arith.constant 0 : i32
    %1 = arith.cmpi eq, %arg0, %c0_i32 : i32
    %2 = arith.extui %1 : i1 to i32
    %c0_i32_0 = arith.constant 0 : i32
    %3 = arith.cmpi ne, %2, %c0_i32_0 : i32
    scf.if %3 {
      %cst_93 = arith.constant 0.000000e+00 : f32
      %130 = vector.broadcast %cst_93 : f32 to vector<1x1xf32>
      %c0_94 = arith.constant 0 : index
      %c0_95 = arith.constant 0 : index
      %131 = vector.load %arg7[%c0_94, %c0_95] : memref<1x1xf32, #tpu.memory_space<vmem>>, vector<1x1xf32>
      tpu.vector_store %arg7[%c0_94, %c0_95], %130 {strides = array<i32>} : memref<1x1xf32, #tpu.memory_space<vmem>>, vector<1x1xf32>,
    } else {
    }
    %c0_i32_1 = arith.constant 0 : i32
    %4 = arith.addi %0, %c0_i32_1 : i32
    %5 = arith.index_cast %4 : i32 to index
    %6 = memref.load %arg1[%5] : memref<8xi32, #tpu.memory_space<smem>>
    %c0_i32_2 = arith.constant 0 : i32
    %c0_i32_3 = arith.constant 0 : i32
    %7 = tpu.memref_slice %arg3[%6, %c0_i32_3] : memref<16x32xf32, #tpu.memory_space<any>> -> memref<1x32xf32, #tpu.memory_space<any>>
    %c0_i32_4 = arith.constant 0 : i32
    %c0_i32_5 = arith.constant 0 : i32
    %8 = tpu.memref_slice %arg5[%c0_i32_4, %c0_i32_5] : memref<8x32xf32, #tpu.memory_space<vmem>> -> memref<1x32xf32, #tpu.memory_space<vmem>>
    %9 = tpu.memref_slice %arg6[%c0_i32_2] : memref<8x!tpu.dma_semaphore, #tpu.memory_space<semaphore_mem>> -> memref<1x!tpu.dma_semaphore, #tpu.memory_space<semaphore_mem>>
    %10 = tpu.memref_squeeze %9 : memref<1x!tpu.dma_semaphore, #tpu.memory_space<semaphore_mem>> -> memref<!tpu.dma_semaphore, #tpu.memory_space<semaphore_mem>>
    tpu.enqueue_dma source(%7 : memref<1x32xf32, #tpu.memory_space<any>>) target(%8 : memref<1x32xf32, #tpu.memory_space<vmem>>) target_semaphore(%10 : memref<!tpu.dma_semaphore, #tpu.memory_space<semaphore_mem>>)
    %c1_i32 = arith.constant 1 : i32
    %11 = arith.addi %0, %c1_i32 : i32
    %12 = arith.index_cast %11 : i32 to index
    %13 = memref.load %arg1[%12] : memref<8xi32, #tpu.memory_space<smem>>
    %c1_i32_6 = arith.constant 1 : i32
    %c0_i32_7 = arith.constant 0 : i32
    %14 = tpu.memref_slice %arg3[%13, %c0_i32_7] : memref<16x32xf32, #tpu.memory_space<any>> -> memref<1x32xf32, #tpu.memory_space<any>>
    %c1_i32_8 = arith.constant 1 : i32
    %c0_i32_9 = arith.constant 0 : i32
    %15 = tpu.memref_slice %arg5[%c1_i32_8, %c0_i32_9] : memref<8x32xf32, #tpu.memory_space<vmem>> -> memref<1x32xf32, #tpu.memory_space<vmem>>
    %16 = tpu.memref_slice %arg6[%c1_i32_6] : memref<8x!tpu.dma_semaphore, #tpu.memory_space<semaphore_mem>> -> memref<1x!tpu.dma_semaphore, #tpu.memory_space<semaphore_mem>>
    %17 = tpu.memref_squeeze %16 : memref<1x!tpu.dma_semaphore, #tpu.memory_space<semaphore_mem>> -> memref<!tpu.dma_semaphore, #tpu.memory_space<semaphore_mem>>
    tpu.enqueue_dma source(%14 : memref<1x32xf32, #tpu.memory_space<any>>) target(%15 : memref<1x32xf32, #tpu.memory_space<vmem>>) target_semaphore(%17 : memref<!tpu.dma_semaphore, #tpu.memory_space<semaphore_mem>>)
    %c2_i32 = arith.constant 2 : i32
    %18 = arith.addi %0, %c2_i32 : i32
    %19 = arith.index_cast %18 : i32 to index
    %20 = memref.load %arg1[%19] : memref<8xi32, #tpu.memory_space<smem>>
    %c2_i32_10 = arith.constant 2 : i32
    %c0_i32_11 = arith.constant 0 : i32
    %21 = tpu.memref_slice %arg3[%20, %c0_i32_11] : memref<16x32xf32, #tpu.memory_space<any>> -> memref<1x32xf32, #tpu.memory_space<any>>
    %c2_i32_12 = arith.constant 2 : i32
    %c0_i32_13 = arith.constant 0 : i32
    %22 = tpu.memref_slice %arg5[%c2_i32_12, %c0_i32_13] : memref<8x32xf32, #tpu.memory_space<vmem>> -> memref<1x32xf32, #tpu.memory_space<vmem>>
    %23 = tpu.memref_slice %arg6[%c2_i32_10] : memref<8x!tpu.dma_semaphore, #tpu.memory_space<semaphore_mem>> -> memref<1x!tpu.dma_semaphore, #tpu.memory_space<semaphore_mem>>
    %24 = tpu.memref_squeeze %23 : memref<1x!tpu.dma_semaphore, #tpu.memory_space<semaphore_mem>> -> memref<!tpu.dma_semaphore, #tpu.memory_space<semaphore_mem>>
    tpu.enqueue_dma source(%21 : memref<1x32xf32, #tpu.memory_space<any>>) target(%22 : memref<1x32xf32, #tpu.memory_space<vmem>>) target_semaphore(%24 : memref<!tpu.dma_semaphore, #tpu.memory_space<semaphore_mem>>)
    %c3_i32 = arith.constant 3 : i32
    %25 = arith.addi %0, %c3_i32 : i32
    %26 = arith.index_cast %25 : i32 to index
    %27 = memref.load %arg1[%26] : memref<8xi32, #tpu.memory_space<smem>>
    %c3_i32_14 = arith.constant 3 : i32
    %c0_i32_15 = arith.constant 0 : i32
    %28 = tpu.memref_slice %arg3[%27, %c0_i32_15] : memref<16x32xf32, #tpu.memory_space<any>> -> memref<1x32xf32, #tpu.memory_space<any>>
    %c3_i32_16 = arith.constant 3 : i32
    %c0_i32_17 = arith.constant 0 : i32
    %29 = tpu.memref_slice %arg5[%c3_i32_16, %c0_i32_17] : memref<8x32xf32, #tpu.memory_space<vmem>> -> memref<1x32xf32, #tpu.memory_space<vmem>>
    %30 = tpu.memref_slice %arg6[%c3_i32_14] : memref<8x!tpu.dma_semaphore, #tpu.memory_space<semaphore_mem>> -> memref<1x!tpu.dma_semaphore, #tpu.memory_space<semaphore_mem>>
    %31 = tpu.memref_squeeze %30 : memref<1x!tpu.dma_semaphore, #tpu.memory_space<semaphore_mem>> -> memref<!tpu.dma_semaphore, #tpu.memory_space<semaphore_mem>>
    tpu.enqueue_dma source(%28 : memref<1x32xf32, #tpu.memory_space<any>>) target(%29 : memref<1x32xf32, #tpu.memory_space<vmem>>) target_semaphore(%31 : memref<!tpu.dma_semaphore, #tpu.memory_space<semaphore_mem>>)
    %c4_i32 = arith.constant 4 : i32
    %32 = arith.addi %0, %c4_i32 : i32
    %33 = arith.index_cast %32 : i32 to index
    %34 = memref.load %arg1[%33] : memref<8xi32, #tpu.memory_space<smem>>
    %c4_i32_18 = arith.constant 4 : i32
    %c0_i32_19 = arith.constant 0 : i32
    %35 = tpu.memref_slice %arg3[%34, %c0_i32_19] : memref<16x32xf32, #tpu.memory_space<any>> -> memref<1x32xf32, #tpu.memory_space<any>>
    %c4_i32_20 = arith.constant 4 : i32
    %c0_i32_21 = arith.constant 0 : i32
    %36 = tpu.memref_slice %arg5[%c4_i32_20, %c0_i32_21] : memref<8x32xf32, #tpu.memory_space<vmem>> -> memref<1x32xf32, #tpu.memory_space<vmem>>
    %37 = tpu.memref_slice %arg6[%c4_i32_18] : memref<8x!tpu.dma_semaphore, #tpu.memory_space<semaphore_mem>> -> memref<1x!tpu.dma_semaphore, #tpu.memory_space<semaphore_mem>>
    %38 = tpu.memref_squeeze %37 : memref<1x!tpu.dma_semaphore, #tpu.memory_space<semaphore_mem>> -> memref<!tpu.dma_semaphore, #tpu.memory_space<semaphore_mem>>
    tpu.enqueue_dma source(%35 : memref<1x32xf32, #tpu.memory_space<any>>) target(%36 : memref<1x32xf32, #tpu.memory_space<vmem>>) target_semaphore(%38 : memref<!tpu.dma_semaphore, #tpu.memory_space<semaphore_mem>>)
    %c5_i32 = arith.constant 5 : i32
    %39 = arith.addi %0, %c5_i32 : i32
    %40 = arith.index_cast %39 : i32 to index
    %41 = memref.load %arg1[%40] : memref<8xi32, #tpu.memory_space<smem>>
    %c5_i32_22 = arith.constant 5 : i32
    %c0_i32_23 = arith.constant 0 : i32
    %42 = tpu.memref_slice %arg3[%41, %c0_i32_23] : memref<16x32xf32, #tpu.memory_space<any>> -> memref<1x32xf32, #tpu.memory_space<any>>
    %c5_i32_24 = arith.constant 5 : i32
    %c0_i32_25 = arith.constant 0 : i32
    %43 = tpu.memref_slice %arg5[%c5_i32_24, %c0_i32_25] : memref<8x32xf32, #tpu.memory_space<vmem>> -> memref<1x32xf32, #tpu.memory_space<vmem>>
    %44 = tpu.memref_slice %arg6[%c5_i32_22] : memref<8x!tpu.dma_semaphore, #tpu.memory_space<semaphore_mem>> -> memref<1x!tpu.dma_semaphore, #tpu.memory_space<semaphore_mem>>
    %45 = tpu.memref_squeeze %44 : memref<1x!tpu.dma_semaphore, #tpu.memory_space<semaphore_mem>> -> memref<!tpu.dma_semaphore, #tpu.memory_space<semaphore_mem>>
    tpu.enqueue_dma source(%42 : memref<1x32xf32, #tpu.memory_space<any>>) target(%43 : memref<1x32xf32, #tpu.memory_space<vmem>>) target_semaphore(%45 : memref<!tpu.dma_semaphore, #tpu.memory_space<semaphore_mem>>)
    %c6_i32 = arith.constant 6 : i32
    %46 = arith.addi %0, %c6_i32 : i32
    %47 = arith.index_cast %46 : i32 to index
    %48 = memref.load %arg1[%47] : memref<8xi32, #tpu.memory_space<smem>>
    %c6_i32_26 = arith.constant 6 : i32
    %c0_i32_27 = arith.constant 0 : i32
    %49 = tpu.memref_slice %arg3[%48, %c0_i32_27] : memref<16x32xf32, #tpu.memory_space<any>> -> memref<1x32xf32, #tpu.memory_space<any>>
    %c6_i32_28 = arith.constant 6 : i32
    %c0_i32_29 = arith.constant 0 : i32
    %50 = tpu.memref_slice %arg5[%c6_i32_28, %c0_i32_29] : memref<8x32xf32, #tpu.memory_space<vmem>> -> memref<1x32xf32, #tpu.memory_space<vmem>>
    %51 = tpu.memref_slice %arg6[%c6_i32_26] : memref<8x!tpu.dma_semaphore, #tpu.memory_space<semaphore_mem>> -> memref<1x!tpu.dma_semaphore, #tpu.memory_space<semaphore_mem>>
    %52 = tpu.memref_squeeze %51 : memref<1x!tpu.dma_semaphore, #tpu.memory_space<semaphore_mem>> -> memref<!tpu.dma_semaphore, #tpu.memory_space<semaphore_mem>>
    tpu.enqueue_dma source(%49 : memref<1x32xf32, #tpu.memory_space<any>>) target(%50 : memref<1x32xf32, #tpu.memory_space<vmem>>) target_semaphore(%52 : memref<!tpu.dma_semaphore, #tpu.memory_space<semaphore_mem>>)
    %c7_i32 = arith.constant 7 : i32
    %53 = arith.addi %0, %c7_i32 : i32
    %54 = arith.index_cast %53 : i32 to index
    %55 = memref.load %arg1[%54] : memref<8xi32, #tpu.memory_space<smem>>
    %c7_i32_30 = arith.constant 7 : i32
    %c0_i32_31 = arith.constant 0 : i32
    %56 = tpu.memref_slice %arg3[%55, %c0_i32_31] : memref<16x32xf32, #tpu.memory_space<any>> -> memref<1x32xf32, #tpu.memory_space<any>>
    %c7_i32_32 = arith.constant 7 : i32
    %c0_i32_33 = arith.constant 0 : i32
    %57 = tpu.memref_slice %arg5[%c7_i32_32, %c0_i32_33] : memref<8x32xf32, #tpu.memory_space<vmem>> -> memref<1x32xf32, #tpu.memory_space<vmem>>
    %58 = tpu.memref_slice %arg6[%c7_i32_30] : memref<8x!tpu.dma_semaphore, #tpu.memory_space<semaphore_mem>> -> memref<1x!tpu.dma_semaphore, #tpu.memory_space<semaphore_mem>>
    %59 = tpu.memref_squeeze %58 : memref<1x!tpu.dma_semaphore, #tpu.memory_space<semaphore_mem>> -> memref<!tpu.dma_semaphore, #tpu.memory_space<semaphore_mem>>
    tpu.enqueue_dma source(%56 : memref<1x32xf32, #tpu.memory_space<any>>) target(%57 : memref<1x32xf32, #tpu.memory_space<vmem>>) target_semaphore(%59 : memref<!tpu.dma_semaphore, #tpu.memory_space<semaphore_mem>>)
    %c0_i32_34 = arith.constant 0 : i32
    %c0_i32_35 = arith.constant 0 : i32
    %c0_i32_36 = arith.constant 0 : i32
    %60 = tpu.memref_slice %arg3[%c0_i32_35, %c0_i32_36] : memref<16x32xf32, #tpu.memory_space<any>> -> memref<1x32xf32, #tpu.memory_space<any>>
    %c0_i32_37 = arith.constant 0 : i32
    %c0_i32_38 = arith.constant 0 : i32
    %61 = tpu.memref_slice %arg5[%c0_i32_37, %c0_i32_38] : memref<8x32xf32, #tpu.memory_space<vmem>> -> memref<1x32xf32, #tpu.memory_space<vmem>>
    %62 = tpu.memref_slice %arg6[%c0_i32_34] : memref<8x!tpu.dma_semaphore, #tpu.memory_space<semaphore_mem>> -> memref<1x!tpu.dma_semaphore, #tpu.memory_space<semaphore_mem>>
    %63 = tpu.memref_squeeze %62 : memref<1x!tpu.dma_semaphore, #tpu.memory_space<semaphore_mem>> -> memref<!tpu.dma_semaphore, #tpu.memory_space<semaphore_mem>>
    tpu.wait_dma2 semaphore(%63 : memref<!tpu.dma_semaphore, #tpu.memory_space<semaphore_mem>>) src(%60 : memref<1x32xf32, #tpu.memory_space<any>>) dst(%61 : memref<1x32xf32, #tpu.memory_space<vmem>>)
    %c1_i32_39 = arith.constant 1 : i32
    %c0_i32_40 = arith.constant 0 : i32
    %c0_i32_41 = arith.constant 0 : i32
    %64 = tpu.memref_slice %arg3[%c0_i32_40, %c0_i32_41] : memref<16x32xf32, #tpu.memory_space<any>> -> memref<1x32xf32, #tpu.memory_space<any>>
    %c1_i32_42 = arith.constant 1 : i32
    %c0_i32_43 = arith.constant 0 : i32
    %65 = tpu.memref_slice %arg5[%c1_i32_42, %c0_i32_43] : memref<8x32xf32, #tpu.memory_space<vmem>> -> memref<1x32xf32, #tpu.memory_space<vmem>>
    %66 = tpu.memref_slice %arg6[%c1_i32_39] : memref<8x!tpu.dma_semaphore, #tpu.memory_space<semaphore_mem>> -> memref<1x!tpu.dma_semaphore, #tpu.memory_space<semaphore_mem>>
    %67 = tpu.memref_squeeze %66 : memref<1x!tpu.dma_semaphore, #tpu.memory_space<semaphore_mem>> -> memref<!tpu.dma_semaphore, #tpu.memory_space<semaphore_mem>>
    tpu.wait_dma2 semaphore(%67 : memref<!tpu.dma_semaphore, #tpu.memory_space<semaphore_mem>>) src(%64 : memref<1x32xf32, #tpu.memory_space<any>>) dst(%65 : memref<1x32xf32, #tpu.memory_space<vmem>>)
    %c2_i32_44 = arith.constant 2 : i32
    %c0_i32_45 = arith.constant 0 : i32
    %c0_i32_46 = arith.constant 0 : i32
    %68 = tpu.memref_slice %arg3[%c0_i32_45, %c0_i32_46] : memref<16x32xf32, #tpu.memory_space<any>> -> memref<1x32xf32, #tpu.memory_space<any>>
    %c2_i32_47 = arith.constant 2 : i32
    %c0_i32_48 = arith.constant 0 : i32
    %69 = tpu.memref_slice %arg5[%c2_i32_47, %c0_i32_48] : memref<8x32xf32, #tpu.memory_space<vmem>> -> memref<1x32xf32, #tpu.memory_space<vmem>>
    %70 = tpu.memref_slice %arg6[%c2_i32_44] : memref<8x!tpu.dma_semaphore, #tpu.memory_space<semaphore_mem>> -> memref<1x!tpu.dma_semaphore, #tpu.memory_space<semaphore_mem>>
    %71 = tpu.memref_squeeze %70 : memref<1x!tpu.dma_semaphore, #tpu.memory_space<semaphore_mem>> -> memref<!tpu.dma_semaphore, #tpu.memory_space<semaphore_mem>>
    tpu.wait_dma2 semaphore(%71 : memref<!tpu.dma_semaphore, #tpu.memory_space<semaphore_mem>>) src(%68 : memref<1x32xf32, #tpu.memory_space<any>>) dst(%69 : memref<1x32xf32, #tpu.memory_space<vmem>>)
    %c3_i32_49 = arith.constant 3 : i32
    %c0_i32_50 = arith.constant 0 : i32
    %c0_i32_51 = arith.constant 0 : i32
    %72 = tpu.memref_slice %arg3[%c0_i32_50, %c0_i32_51] : memref<16x32xf32, #tpu.memory_space<any>> -> memref<1x32xf32, #tpu.memory_space<any>>
    %c3_i32_52 = arith.constant 3 : i32
    %c0_i32_53 = arith.constant 0 : i32
    %73 = tpu.memref_slice %arg5[%c3_i32_52, %c0_i32_53] : memref<8x32xf32, #tpu.memory_space<vmem>> -> memref<1x32xf32, #tpu.memory_space<vmem>>
    %74 = tpu.memref_slice %arg6[%c3_i32_49] : memref<8x!tpu.dma_semaphore, #tpu.memory_space<semaphore_mem>> -> memref<1x!tpu.dma_semaphore, #tpu.memory_space<semaphore_mem>>
    %75 = tpu.memref_squeeze %74 : memref<1x!tpu.dma_semaphore, #tpu.memory_space<semaphore_mem>> -> memref<!tpu.dma_semaphore, #tpu.memory_space<semaphore_mem>>
    tpu.wait_dma2 semaphore(%75 : memref<!tpu.dma_semaphore, #tpu.memory_space<semaphore_mem>>) src(%72 : memref<1x32xf32, #tpu.memory_space<any>>) dst(%73 : memref<1x32xf32, #tpu.memory_space<vmem>>)
    %c4_i32_54 = arith.constant 4 : i32
    %c0_i32_55 = arith.constant 0 : i32
    %c0_i32_56 = arith.constant 0 : i32
    %76 = tpu.memref_slice %arg3[%c0_i32_55, %c0_i32_56] : memref<16x32xf32, #tpu.memory_space<any>> -> memref<1x32xf32, #tpu.memory_space<any>>
    %c4_i32_57 = arith.constant 4 : i32
    %c0_i32_58 = arith.constant 0 : i32
    %77 = tpu.memref_slice %arg5[%c4_i32_57, %c0_i32_58] : memref<8x32xf32, #tpu.memory_space<vmem>> -> memref<1x32xf32, #tpu.memory_space<vmem>>
    %78 = tpu.memref_slice %arg6[%c4_i32_54] : memref<8x!tpu.dma_semaphore, #tpu.memory_space<semaphore_mem>> -> memref<1x!tpu.dma_semaphore, #tpu.memory_space<semaphore_mem>>
    %79 = tpu.memref_squeeze %78 : memref<1x!tpu.dma_semaphore, #tpu.memory_space<semaphore_mem>> -> memref<!tpu.dma_semaphore, #tpu.memory_space<semaphore_mem>>
    tpu.wait_dma2 semaphore(%79 : memref<!tpu.dma_semaphore, #tpu.memory_space<semaphore_mem>>) src(%76 : memref<1x32xf32, #tpu.memory_space<any>>) dst(%77 : memref<1x32xf32, #tpu.memory_space<vmem>>)
    %c5_i32_59 = arith.constant 5 : i32
    %c0_i32_60 = arith.constant 0 : i32
    %c0_i32_61 = arith.constant 0 : i32
    %80 = tpu.memref_slice %arg3[%c0_i32_60, %c0_i32_61] : memref<16x32xf32, #tpu.memory_space<any>> -> memref<1x32xf32, #tpu.memory_space<any>>
    %c5_i32_62 = arith.constant 5 : i32
    %c0_i32_63 = arith.constant 0 : i32
    %81 = tpu.memref_slice %arg5[%c5_i32_62, %c0_i32_63] : memref<8x32xf32, #tpu.memory_space<vmem>> -> memref<1x32xf32, #tpu.memory_space<vmem>>
    %82 = tpu.memref_slice %arg6[%c5_i32_59] : memref<8x!tpu.dma_semaphore, #tpu.memory_space<semaphore_mem>> -> memref<1x!tpu.dma_semaphore, #tpu.memory_space<semaphore_mem>>
    %83 = tpu.memref_squeeze %82 : memref<1x!tpu.dma_semaphore, #tpu.memory_space<semaphore_mem>> -> memref<!tpu.dma_semaphore, #tpu.memory_space<semaphore_mem>>
    tpu.wait_dma2 semaphore(%83 : memref<!tpu.dma_semaphore, #tpu.memory_space<semaphore_mem>>) src(%80 : memref<1x32xf32, #tpu.memory_space<any>>) dst(%81 : memref<1x32xf32, #tpu.memory_space<vmem>>)
    %c6_i32_64 = arith.constant 6 : i32
    %c0_i32_65 = arith.constant 0 : i32
    %c0_i32_66 = arith.constant 0 : i32
    %84 = tpu.memref_slice %arg3[%c0_i32_65, %c0_i32_66] : memref<16x32xf32, #tpu.memory_space<any>> -> memref<1x32xf32, #tpu.memory_space<any>>
    %c6_i32_67 = arith.constant 6 : i32
    %c0_i32_68 = arith.constant 0 : i32
    %85 = tpu.memref_slice %arg5[%c6_i32_67, %c0_i32_68] : memref<8x32xf32, #tpu.memory_space<vmem>> -> memref<1x32xf32, #tpu.memory_space<vmem>>
    %86 = tpu.memref_slice %arg6[%c6_i32_64] : memref<8x!tpu.dma_semaphore, #tpu.memory_space<semaphore_mem>> -> memref<1x!tpu.dma_semaphore, #tpu.memory_space<semaphore_mem>>
    %87 = tpu.memref_squeeze %86 : memref<1x!tpu.dma_semaphore, #tpu.memory_space<semaphore_mem>> -> memref<!tpu.dma_semaphore, #tpu.memory_space<semaphore_mem>>
    tpu.wait_dma2 semaphore(%87 : memref<!tpu.dma_semaphore, #tpu.memory_space<semaphore_mem>>) src(%84 : memref<1x32xf32, #tpu.memory_space<any>>) dst(%85 : memref<1x32xf32, #tpu.memory_space<vmem>>)
    %c7_i32_69 = arith.constant 7 : i32
    %c0_i32_70 = arith.constant 0 : i32
    %c0_i32_71 = arith.constant 0 : i32
    %88 = tpu.memref_slice %arg3[%c0_i32_70, %c0_i32_71] : memref<16x32xf32, #tpu.memory_space<any>> -> memref<1x32xf32, #tpu.memory_space<any>>
    %c7_i32_72 = arith.constant 7 : i32
    %c0_i32_73 = arith.constant 0 : i32
    %89 = tpu.memref_slice %arg5[%c7_i32_72, %c0_i32_73] : memref<8x32xf32, #tpu.memory_space<vmem>> -> memref<1x32xf32, #tpu.memory_space<vmem>>
    %90 = tpu.memref_slice %arg6[%c7_i32_69] : memref<8x!tpu.dma_semaphore, #tpu.memory_space<semaphore_mem>> -> memref<1x!tpu.dma_semaphore, #tpu.memory_space<semaphore_mem>>
    %91 = tpu.memref_squeeze %90 : memref<1x!tpu.dma_semaphore, #tpu.memory_space<semaphore_mem>> -> memref<!tpu.dma_semaphore, #tpu.memory_space<semaphore_mem>>
    tpu.wait_dma2 semaphore(%91 : memref<!tpu.dma_semaphore, #tpu.memory_space<semaphore_mem>>) src(%88 : memref<1x32xf32, #tpu.memory_space<any>>) dst(%89 : memref<1x32xf32, #tpu.memory_space<vmem>>)
    %c0 = arith.constant 0 : index
    %c0_74 = arith.constant 0 : index
    %92 = vector.load %arg2[%c0, %c0_74] : memref<8x32xf32, #tpu.memory_space<vmem>>, vector<8x32xf32>
    %c0_75 = arith.constant 0 : index
    %c0_76 = arith.constant 0 : index
    %93 = vector.load %arg5[%c0_75, %c0_76] : memref<8x32xf32, #tpu.memory_space<vmem>>, vector<8x32xf32>
    %cst = arith.constant dense<0xFF800000> : vector<8xf32>
    %94 = vector.multi_reduction <maximumf>, %92, %cst [1] : vector<8x32xf32> to vector<8xf32>
    %95 = vector.shape_cast %94 : vector<8xf32> to vector<8x1xf32>
    %96 = vector.broadcast %95 : vector<8x1xf32> to vector<8x32xf32>
    %97 = arith.subf %92, %96 : vector<8x32xf32>
    %98 = math.exp %97 : vector<8x32xf32>
    %cst_77 = arith.constant dense<0.000000e+00> : vector<8xf32>
    %99 = vector.multi_reduction <add>, %98, %cst_77 [1] : vector<8x32xf32> to vector<8xf32>
    %100 = vector.shape_cast %99 : vector<8xf32> to vector<8x1xf32>
    %101 = math.log %100 : vector<8x1xf32>
    %102 = arith.mulf %93, %97 : vector<8x32xf32>
    %cst_78 = arith.constant dense<0.000000e+00> : vector<8xf32>
    %103 = vector.multi_reduction <add>, %102, %cst_78 [1] : vector<8x32xf32> to vector<8xf32>
    %104 = vector.shape_cast %103 : vector<8xf32> to vector<8x1xf32>
    %cst_79 = arith.constant dense<0.000000e+00> : vector<8xf32>
    %105 = vector.multi_reduction <add>, %93, %cst_79 [1] : vector<8x32xf32> to vector<8xf32>
    %106 = vector.shape_cast %105 : vector<8xf32> to vector<8x1xf32>
    %107 = arith.mulf %106, %101 : vector<8x1xf32>
    %108 = arith.subf %104, %107 : vector<8x1xf32>
    %109 = tpu.iota {dimensions = array<i32: 0>} : vector<8x1xi32>
    %110 = vector.broadcast %0 : i32 to vector<8x1xi32>
    %111 = arith.addi %110, %109 : vector<8x1xi32>
    %c8_i32_80 = arith.constant 8 : i32
    %112 = vector.broadcast %c8_i32_80 : i32 to vector<8x1xi32>
    %113 = arith.cmpi slt, %111, %112 : vector<8x1xi32>
    %cst_81 = arith.constant 0.000000e+00 : f32
    %114 = vector.broadcast %cst_81 : f32 to vector<8x1xf32>
    %115 = arith.select %113, %108, %114 : vector<8x1xi1>, vector<8x1xf32>
    %c0_82 = arith.constant 0 : index
    %c0_83 = arith.constant 0 : index
    %116 = vector.load %arg7[%c0_82, %c0_83] : memref<1x1xf32, #tpu.memory_space<vmem>>, vector<1x1xf32>
    %117 = vector.shape_cast %115 : vector<8x1xf32> to vector<1x8x1xf32>
    %cst_84 = arith.constant dense<0.000000e+00> : vector<1xf32>
    %118 = vector.multi_reduction <add>, %117, %cst_84 [1, 2] : vector<1x8x1xf32> to vector<1xf32>
    %119 = vector.shape_cast %118 : vector<1xf32> to vector<1x1x1xf32>
    %120 = vector.extract %119[0, 0, 0] : f32 from vector<1x1x1xf32>
    %121 = vector.broadcast %120 : f32 to vector<1x1xf32>
    %122 = arith.addf %116, %121 : vector<1x1xf32>
    %c0_85 = arith.constant 0 : index
    %c0_86 = arith.constant 0 : index
    %123 = vector.load %arg7[%c0_85, %c0_86] : memref<1x1xf32, #tpu.memory_space<vmem>>, vector<1x1xf32>
    tpu.vector_store %arg7[%c0_85, %c0_86], %122 {strides = array<i32>} : memref<1x1xf32, #tpu.memory_space<vmem>>, vector<1x1xf32>,
    %c0_87 = arith.constant 0 : index
    %c0_88 = arith.constant 0 : index
    %124 = vector.load %arg7[%c0_87, %c0_88] : memref<1x1xf32, #tpu.memory_space<vmem>>, vector<1x1xf32>
    %cst_89 = arith.constant 0.000000e+00 : f32
    %125 = vector.broadcast %cst_89 : f32 to vector<1x1xf32>
    %126 = arith.subf %125, %124 : vector<1x1xf32>
    %cst_90 = arith.constant 8.000000e+00 : f32
    %127 = vector.broadcast %cst_90 : f32 to vector<1x1xf32>
    %128 = arith.divf %126, %127 : vector<1x1xf32>
    %c0_91 = arith.constant 0 : index
    %c0_92 = arith.constant 0 : index
    %129 = vector.load %arg4[%c0_91, %c0_92] : memref<1x1xf32, #tpu.memory_space<vmem>>, vector<1x1xf32>
    tpu.vector_store %arg4[%c0_91, %c0_92], %128 {strides = array<i32>} : memref<1x1xf32, #tpu.memory_space<vmem>>, vector<1x1xf32>,
    return
  }
  func.func @transform_0(%arg0: i32, %arg1: memref<8xi32, #tpu.memory_space<smem>>) -> (i32, i32) {
    %c0_i32 = arith.constant 0 : i32
    %c0_i32_0 = arith.constant 0 : i32
    return %arg0, %c0_i32 : i32, i32
  }
  func.func @transform_2(%arg0: i32, %arg1: memref<8xi32, #tpu.memory_space<smem>>) -> (i32, i32) {
    %c0_i32 = arith.constant 0 : i32
    %c0_i32_0 = arith.constant 0 : i32
    %c0_i32_1 = arith.constant 0 : i32
    return %c0_i32, %c0_i32_0 : i32, i32
  }
}

</mosaic_0001>

<bundles_post_ra>
// kernel: tpu_custom_call.1
= control target key start
LH: loop header
LB: loop body
LE: loop exit
PB: predicated region body
PF: predicated region fallthrough
CT: control target
= control target key end

     0   :  { %s831_s0 = inlined_call_operand.hbm [shape: s32[8], index: 0, kind: input, shape index: {}]   ;;  %s832_s1 = inlined_call_operand.hbm [shape: f32[8,32], index: 1, kind: input, shape index: {}]   ;;  %s833_s2 = inlined_call_operand.hbm [shape: f32[16,32], index: 2, kind: input, shape index: {}]   ;;  %s834_s3 = inlined_call_operand.hbm [shape: f32[1,1], index: 3, kind: output, shape index: {}]  }
   0x1   :  { %s361_s14 = scalar_lea.hbm %s831_s0, 16 }
   0x2   :  { %p362_p0 = scmp.ne.s32.totalorder %s831_s0, %s361_s14  ;;  %p365_p1 = scmp.lt.u32.totalorder %s361_s14, %s831_s0 }
   0x4   :  { %p367_p2 = pnand %p365_p1, %p362_p0 }
   0x6   :  { %370 = shalt.err (!%p367_p2)  }
   0x7   :  { %s629_s19 = smov [#allocation6]  }
   0x8   :  { %9 = dma.hbm_to_smem %s831_s0, 16, %s629_s19, [#allocation5] }
   0x9   :  { %607 = dma.done.wait [#allocation5], 16 }
   0xa   :  { %608 = vsyncadd [#allocation5], 4294967280 }
   0xb   :  { %11 = sfence }
   0xc   :  { %12 = vsyncpa [#allocation8], 0 }
   0xd   :  { %13 = vsyncpa [#allocation9], 0  ;;  %s630_s22 = smov [#allocation7]   ;;  %s371_s26 = scalar_lea.hbm %s832_s1, 128 }
   0xe   :  { %s20_s23 = sshll.u32 %s630_s22, 4  ;;  %p372_p3 = scmp.ne.s32.totalorder %s832_s1, %s371_s26  ;;  %s21_s23 = int_to_ptr.vmem [resolvable:$true] %s20_s23 }
   0xf   :  { %p375_p4 = scmp.lt.u32.totalorder %s371_s26, %s832_s1 }
  0x11   :  { %p377_p5 = pnand %p375_p4, %p372_p3 }
  0x13   :  { %380 = shalt.err (!%p377_p5)
}
  0x14   :  { %s381_s0 = scalar_lea.vmem %s21_s23, 128  ;;  %p386_p7 = scmp.lt.s32.totalorder %s21_s23, %s21_s23 }
  0x15   :  { %p382_p6 = scmp.ne.s32.totalorder %s21_s23, %s381_s0  ;;  %p387_p8 = scmp.lt.s32.totalorder %s381_s0, %s381_s0 }
  0x17   :  { %p388_p9 = por %p387_p8, %p386_p7 }
  0x19   :  { %p389_p10 = pnand %p388_p9, %p382_p6 }
  0x1b   :  { %392 = shalt.err (!%p389_p10)
}
  0x1c   :  { %23 = dma.hbm_to_vmem [thread:$0]  %s832_s1, 128, %s21_s23, [#allocation8]  }
  0x1d   :  { %609 = dma.done.wait [#allocation8], 128  }
  0x1e   :  { %610 = vsyncadd [#allocation8], 4294967168  ;;  %vm32_vm0 = vcmask 0   ;;  %s34_s6 = sld [smem:[#allocation6]]  ;;  %s631_s7 = smov [#allocation2]   ;;  %v632_v0 = vmov 0.0  }
  0x1f   :  { %s44_s8 = sshll.u32 %s631_s7, 4  ;;  %33 = vst.msk [vmem:[#allocation4] sm:$0x1] %vm32_vm0, %v632_v0  ;;  %s688_s9 = sld [smem:[#allocation6 + $0x1]]  ;;  %s686_s8 = int_to_ptr.vmem [resolvable:$true] %s44_s8 }
  0x20   :  { %s633_s10 = smov [#allocation2 + $0x1]   ;;  %s690_s12 = sld [smem:[#allocation6 + $0x2]] }
  0x21   :  { %s61_s11 = sshll.u32 %s633_s10, 4  ;;  %s634_s1 = smov [#allocation2 + $0x2]   ;;  %s692_s11 = int_to_ptr.vmem [resolvable:$true] %s61_s11 }
  0x22   :  { %s78_s13 = sshll.u32 %s634_s1, 4  ;;  %s694_s14 = sld [smem:[#allocation6 + $0x3]]  ;;  %s696_s13 = int_to_ptr.vmem [resolvable:$true] %s78_s13 }
  0x23   :  { %s635_s16 = smov [#allocation2 + $0x3]   ;;  %s707_s25 = scalar_lea.hbm %s833_s2, 256 }
  0x24   :  { %s320_s15 = sshll.u32 %s34_s6, 4  ;;  %s698_s17 = sshll.u32 %s635_s16, 4  ;;  %s96_s17 = int_to_ptr.vmem [resolvable:$true] %s698_s17 }
  0x25   :  { %s36_s20 = scalar_lea.hbm %s833_s2, %s320_s15  ;;  %s322_s21 = sshll.u32 %s688_s9, 4 }
  0x26   :  { %s393_s22 = scalar_lea.hbm %s36_s20, 16  ;;  %p396_p12 = scmp.lt.u32.totalorder %s36_s20, %s833_s2 }
  0x27   :  { %p394_p11 = scmp.ne.s32.totalorder %s36_s20, %s393_s22  ;;  %p397_p13 = scmp.lt.u32.totalorder %s707_s25, %s393_s22 }
  0x28   :  { %p399_p1 = scmp.lt.u32.totalorder %s393_s22, %s36_s20 }
  0x29   :  { %p398_p0 = por %p397_p13, %p396_p12 }
  0x2b   :  { %p400_p2 = por %p399_p1, %p398_p0 }
  0x2d   :  { %p401_p3 = pnand %p400_p2, %p394_p11 }
  0x2f   :  { %404 = shalt.err (!%p401_p3)  }
  0x30   :  { %s405_s28 = scalar_lea.vmem %s686_s8, 16  ;;  %s716_s29 = scalar_lea.vmem %s686_s8, 128 }
  0x31   :  { %p406_p4 = scmp.ne.s32.totalorder %s686_s8, %s405_s28  ;;  %p410_p5 = scmp.lt.s32.totalorder %s686_s8, %s686_s8 }
  0x32   :  { %p411_p6 = scmp.lt.s32.totalorder %s716_s29, %s405_s28 }
  0x34   :  { %p412_p7 = por %p411_p6, %p410_p5 }
  0x36   :  { %p413_p8 = pnand %p412_p7, %p406_p4 }
  0x38   :  { %416 = shalt.err (!%p413_p8)  }
  0x39   :  { %47 = dma.hbm_to_vmem [thread:$0]  %s36_s20, 16, %s686_s8, [#allocation3] }
  0x3a   :  { %s51_s4 = scalar_lea.hbm %s833_s2, %s322_s21  ;;  %s324_s5 = sshll.u32 %s690_s12, 4 }
  0x3b   :  { %s417_s6 = scalar_lea.hbm %s51_s4, 16  ;;  %p420_p10 = scmp.lt.u32.totalorder %s51_s4, %s833_s2 }
  0x3c   :  { %p418_p9 = scmp.ne.s32.totalorder %s51_s4, %s417_s6  ;;  %p421_p11 = scmp.lt.u32.totalorder %s707_s25, %s417_s6 }
  0x3d   :  { %p423_p13 = scmp.lt.u32.totalorder %s417_s6, %s51_s4 }
  0x3e   :  { %p422_p12 = por %p421_p11, %p420_p10 }
  0x40   :  { %p424_p0 = por %p423_p13, %p422_p12 }
  0x42   :  { %p425_p1 = pnand %p424_p0, %p418_p9 }
  0x44   :  { %428 = shalt.err (!%p425_p1)  }
  0x45   :  { %s429_s10 = scalar_lea.vmem %s692_s11, 16  ;;  %p434_p3 = scmp.lt.s32.totalorder %s692_s11, %s686_s8 }
  0x46   :  { %p430_p2 = scmp.ne.s32.totalorder %s692_s11, %s429_s10  ;;  %p435_p4 = scmp.lt.s32.totalorder %s716_s29, %s429_s10 }
  0x48   :  { %p436_p5 = por %p435_p4, %p434_p3 }
  0x4a   :  { %p437_p6 = pnand %p436_p5, %p430_p2 }
  0x4c   :  { %440 = shalt.err (!%p437_p6)  }
  0x4d   :  { %64 = dma.hbm_to_vmem [thread:$0]  %s51_s4, 16, %s692_s11, [#allocation3 + $0x1] }
  0x4e   :  { %s68_s15 = scalar_lea.hbm %s833_s2, %s324_s5  ;;  %s326_s16 = sshll.u32 %s694_s14, 4 }
  0x4f   :  { %s441_s18 = scalar_lea.hbm %s68_s15, 16  ;;  %p444_p8 = scmp.lt.u32.totalorder %s68_s15, %s833_s2 }
  0x50   :  { %p442_p7 = scmp.ne.s32.totalorder %s68_s15, %s441_s18  ;;  %p445_p9 = scmp.lt.u32.totalorder %s707_s25, %s441_s18 }
  0x51   :  { %p447_p11 = scmp.lt.u32.totalorder %s441_s18, %s68_s15 }
  0x52   :  { %p446_p10 = por %p445_p9, %p444_p8 }
  0x54   :  { %p448_p12 = por %p447_p11, %p446_p10 }
  0x56   :  { %p449_p13 = pnand %p448_p12, %p442_p7 }
  0x58   :  { %452 = shalt.err (!%p449_p13)  }
  0x59   :  { %s453_s11 = scalar_lea.vmem %s696_s13, 16  ;;  %p458_p1 = scmp.lt.s32.totalorder %s696_s13, %s686_s8 }
  0x5a   :  { %p454_p0 = scmp.ne.s32.totalorder %s696_s13, %s453_s11  ;;  %p459_p2 = scmp.lt.s32.totalorder %s716_s29, %s453_s11 }
  0x5c   :  { %p460_p3 = por %p459_p2, %p458_p1 }
  0x5e   :  { %p461_p4 = pnand %p460_p3, %p454_p0 }
  0x60   :  { %464 = shalt.err (!%p461_p4)  }
  0x61   :  { %81 = dma.hbm_to_vmem [thread:$0]  %s68_s15, 16, %s696_s13, [#allocation3 + $0x2] }
  0x62   :  { %s85_s22 = scalar_lea.hbm %s833_s2, %s326_s16 }
  0x63   :  { %s465_s23 = scalar_lea.hbm %s85_s22, 16  ;;  %p468_p6 = scmp.lt.u32.totalorder %s85_s22, %s833_s2 }
  0x64   :  { %p466_p5 = scmp.ne.s32.totalorder %s85_s22, %s465_s23  ;;  %p469_p7 = scmp.lt.u32.totalorder %s707_s25, %s465_s23 }
  0x65   :  { %p471_p9 = scmp.lt.u32.totalorder %s465_s23, %s85_s22 }
  0x66   :  { %p470_p8 = por %p469_p7, %p468_p6 }
  0x68   :  { %p472_p10 = por %p471_p9, %p470_p8 }
  0x6a   :  { %p473_p11 = pnand %p472_p10, %p466_p5 }
  0x6c   :  { %476 = shalt.err (!%p473_p11)  }
  0x6d   :  { %s477_s27 = scalar_lea.vmem %s96_s17, 16  ;;  %p482_p13 = scmp.lt.s32.totalorder %s96_s17, %s686_s8 }
  0x6e   :  { %p478_p12 = scmp.ne.s32.totalorder %s96_s17, %s477_s27  ;;  %p483_p0 = scmp.lt.s32.totalorder %s716_s29, %s477_s27 }
  0x70   :  { %p484_p1 = por %p483_p0, %p482_p13 }
  0x72   :  { %p485_p2 = pnand %p484_p1, %p478_p12 }
  0x74   :  { %488 = shalt.err (!%p485_p2)  }
  0x75   :  { %98 = dma.hbm_to_vmem [thread:$0]  %s85_s22, 16, %s96_s17, [#allocation3 + $0x3] }
  0x76   :  { %s327_s13 = sld [smem:[#allocation6 + $0x4]]  ;;  %s636_s28 = smov [#allocation2 + $0x4]  }
  0x77   :  { %s112_s30 = sshll.u32 %s636_s28, 4  ;;  %s760_s0 = sld [smem:[#allocation6 + $0x5]]  ;;  %s113_s30 = int_to_ptr.vmem [resolvable:$true] %s112_s30 }
  0x78   :  { %s637_s4 = smov [#allocation2 + $0x5]   ;;  %s762_s6 = sld [smem:[#allocation6 + $0x6]] }
  0x79   :  { %s129_s5 = sshll.u32 %s637_s4, 4  ;;  %s638_s7 = smov [#allocation2 + $0x6]   ;;  %s764_s5 = int_to_ptr.vmem [resolvable:$true] %s129_s5 }
  0x7a   :  { %s146_s9 = sshll.u32 %s638_s7, 4  ;;  %s766_s10 = sld [smem:[#allocation6 + $0x7]]  ;;  %s768_s9 = int_to_ptr.vmem [resolvable:$true] %s146_s9 }
  0x7c   :  { %s328_s12 = sshll.u32 %s327_s13, 4 }
  0x7d   :  { %s102_s15 = scalar_lea.hbm %s833_s2, %s328_s12  ;;  %s330_s16 = sshll.u32 %s760_s0, 4 }
  0x7e   :  { %s489_s18 = scalar_lea.hbm %s102_s15, 16  ;;  %p492_p4 = scmp.lt.u32.totalorder %s102_s15, %s833_s2 }
  0x7f   :  { %p490_p3 = scmp.ne.s32.totalorder %s102_s15, %s489_s18  ;;  %p493_p5 = scmp.lt.u32.totalorder %s707_s25, %s489_s18 }
  0x80   :  { %p495_p7 = scmp.lt.u32.totalorder %s489_s18, %s102_s15 }
  0x81   :  { %p494_p6 = por %p493_p5, %p492_p4 }
  0x83   :  { %p496_p8 = por %p495_p7, %p494_p6 }
  0x85   :  { %p497_p9 = pnand %p496_p8, %p490_p3 }
  0x87   :  { %500 = shalt.err (!%p497_p9)  }
  0x88   :  { %s501_s11 = scalar_lea.vmem %s113_s30, 16  ;;  %p506_p11 = scmp.lt.s32.totalorder %s113_s30, %s686_s8 }
  0x89   :  { %p502_p10 = scmp.ne.s32.totalorder %s113_s30, %s501_s11  ;;  %p507_p12 = scmp.lt.s32.totalorder %s716_s29, %s501_s11 }
  0x8b   :  { %p508_p13 = por %p507_p12, %p506_p11 }
  0x8d   :  { %p509_p0 = pnand %p508_p13, %p502_p10 }
  0x8f   :  { %512 = shalt.err (!%p509_p0)  }
  0x90   :  { %115 = dma.hbm_to_vmem [thread:$0]  %s102_s15, 16, %s113_s30, [#allocation3 + $0x4] }
  0x91   :  { %s119_s22 = scalar_lea.hbm %s833_s2, %s330_s16  ;;  %s332_s23 = sshll.u32 %s762_s6, 4 }
  0x92   :  { %s513_s24 = scalar_lea.hbm %s119_s22, 16  ;;  %p516_p2 = scmp.lt.u32.totalorder %s119_s22, %s833_s2 }
  0x93   :  { %p514_p1 = scmp.ne.s32.totalorder %s119_s22, %s513_s24  ;;  %p517_p3 = scmp.lt.u32.totalorder %s707_s25, %s513_s24 }
  0x94   :  { %p519_p5 = scmp.lt.u32.totalorder %s513_s24, %s119_s22 }
  0x95   :  { %p518_p4 = por %p517_p3, %p516_p2 }
  0x97   :  { %p520_p6 = por %p519_p5, %p518_p4 }
  0x99   :  { %p521_p7 = pnand %p520_p6, %p514_p1 }
  0x9b   :  { %524 = shalt.err (!%p521_p7)  }
  0x9c   :  { %s525_s13 = scalar_lea.vmem %s764_s5, 16  ;;  %p530_p9 = scmp.lt.s32.totalorder %s764_s5, %s686_s8 }
  0x9d   :  { %p526_p8 = scmp.ne.s32.totalorder %s764_s5, %s525_s13  ;;  %p531_p10 = scmp.lt.s32.totalorder %s716_s29, %s525_s13 }
  0x9f   :  { %p532_p11 = por %p531_p10, %p530_p9 }
  0xa1   :  { %p533_p12 = pnand %p532_p11, %p526_p8 }
  0xa3   :  { %536 = shalt.err (!%p533_p12)  }
  0xa4   :  { %132 = dma.hbm_to_vmem [thread:$0]  %s119_s22, 16, %s764_s5, [#allocation3 + $0x5] }
  0xa5   :  { %s136_s0 = scalar_lea.hbm %s833_s2, %s332_s23  ;;  %s334_s4 = sshll.u32 %s766_s10, 4 }
  0xa6   :  { %s537_s6 = scalar_lea.hbm %s136_s0, 16  ;;  %p540_p0 = scmp.lt.u32.totalorder %s136_s0, %s833_s2 }
  0xa7   :  { %p538_p13 = scmp.ne.s32.totalorder %s136_s0, %s537_s6  ;;  %p541_p1 = scmp.lt.u32.totalorder %s707_s25, %s537_s6 }
  0xa8   :  { %p543_p3 = scmp.lt.u32.totalorder %s537_s6, %s136_s0 }
  0xa9   :  { %p542_p2 = por %p541_p1, %p540_p0 }
  0xab   :  { %p544_p4 = por %p543_p3, %p542_p2 }
  0xad   :  { %p545_p5 = pnand %p544_p4, %p538_p13 }
  0xaf   :  { %548 = shalt.err (!%p545_p5)  }
  0xb0   :  { %s549_s5 = scalar_lea.vmem %s768_s9, 16  ;;  %p554_p7 = scmp.lt.s32.totalorder %s768_s9, %s686_s8 }
  0xb1   :  { %p550_p6 = scmp.ne.s32.totalorder %s768_s9, %s549_s5  ;;  %p555_p8 = scmp.lt.s32.totalorder %s716_s29, %s549_s5 }
  0xb3   :  { %p556_p9 = por %p555_p8, %p554_p7 }
  0xb5   :  { %p557_p10 = pnand %p556_p9, %p550_p6 }
  0xb7   :  { %560 = shalt.err (!%p557_p10)  }
  0xb8   :  { %149 = dma.hbm_to_vmem [thread:$0]  %s136_s0, 16, %s768_s9, [#allocation3 + $0x6] }
  0xb9   :  { %s153_s1 = scalar_lea.hbm %s833_s2, %s334_s4  ;;  %s639_s15 = smov [#allocation2 + $0x7]  }
  0xba   :  { %s163_s16 = sshll.u32 %s639_s15, 4  ;;  %s561_s18 = scalar_lea.hbm %s153_s1, 16  ;;  %s164_s16 = int_to_ptr.vmem [resolvable:$true] %s163_s16 }
  0xbb   :  { %p562_p11 = scmp.ne.s32.totalorder %s153_s1, %s561_s18  ;;  %p564_p12 = scmp.lt.u32.totalorder %s153_s1, %s833_s2 }
  0xbc   :  { %p565_p13 = scmp.lt.u32.totalorder %s707_s25, %s561_s18  ;;  %p567_p1 = scmp.lt.u32.totalorder %s561_s18, %s153_s1 }
  0xbe   :  { %p566_p0 = por %p565_p13, %p564_p12 }
  0xc0   :  { %p568_p2 = por %p567_p1, %p566_p0 }
  0xc2   :  { %p569_p3 = pnand %p568_p2, %p562_p11 }
  0xc4   :  { %572 = shalt.err (!%p569_p3)  }
  0xc5   :  { %s573_s9 = scalar_lea.vmem %s164_s16, 16  ;;  %p578_p5 = scmp.lt.s32.totalorder %s164_s16, %s686_s8 }
  0xc6   :  { %p574_p4 = scmp.ne.s32.totalorder %s164_s16, %s573_s9  ;;  %p579_p6 = scmp.lt.s32.totalorder %s716_s29, %s573_s9 }
  0xc8   :  { %p580_p7 = por %p579_p6, %p578_p5 }
  0xca   :  { %p581_p8 = pnand %p580_p7, %p574_p4 }
  0xcc   :  { %584 = shalt.err (!%p581_p8)  }
  0xcd   :  { %166 = dma.hbm_to_vmem [thread:$0]  %s153_s1, 16, %s164_s16, [#allocation3 + $0x7] }
  0xce   :  { %611 = dma.done.wait [#allocation3], 16 }
  0xcf   :  { %612 = vsyncadd [#allocation3], 4294967280 }
  0xd0   :  { %613 = dma.done.wait [#allocation3 + $0x1], 16 }
  0xd1   :  { %614 = vsyncadd [#allocation3 + $0x1], 4294967280 }
  0xd2   :  { %615 = dma.done.wait [#allocation3 + $0x2], 16 }
  0xd3   :  { %616 = vsyncadd [#allocation3 + $0x2], 4294967280 }
  0xd4   :  { %617 = dma.done.wait [#allocation3 + $0x3], 16 }
  0xd5   :  { %618 = vsyncadd [#allocation3 + $0x3], 4294967280 }
  0xd6   :  { %619 = dma.done.wait [#allocation3 + $0x4], 16 }
  0xd7   :  { %620 = vsyncadd [#allocation3 + $0x4], 4294967280 }
  0xd8   :  { %621 = dma.done.wait [#allocation3 + $0x5], 16 }
  0xd9   :  { %622 = vsyncadd [#allocation3 + $0x5], 4294967280 }
  0xda   :  { %623 = dma.done.wait [#allocation3 + $0x6], 16 }
  0xdb   :  { %624 = vsyncadd [#allocation3 + $0x6], 4294967280 }
  0xdc   :  { %625 = dma.done.wait [#allocation3 + $0x7], 16 }
  0xdd   :  { %626 = vsyncadd [#allocation3 + $0x7], 4294967280  ;;  %vm186_vm1 = vcmask 261120   ;;  %v184_v1 = vld [vmem:[#allocation7] sm:$0xff]  ;;  %v185_v3 = vld [vmem:[#allocation2] sm:$0xff]  ;;  %vm214_vm2 = vcmask 7168  }
  0xde   :  { %v187_v2 = vsel %vm186_vm1, %v184_v1, -inf  ;;  %v202_v4 = vsel %vm186_vm1, %v185_v3, 0.0  ;;  %v213_v27 = vld [vmem:[#allocation4] sm:$0x1]  ;;  %s640_s8 = smov [#allocation10]  }
  0xdf   :  { %188 = vmax.xlane.f32.xlu0 %v187_v2  ;;  %203 = vadd.xlane.f32.xlu1 %v202_v4  ;;  %s240_s25 = sshll.u32 %s640_s8, 4  ;;  %s241_s25 = int_to_ptr.vmem [resolvable:$true] %s240_s25 }
  0xe0   :  { %s585_s29 = scalar_lea.vmem %s241_s25, 16  ;;  %s589_s11 = scalar_lea.vmem %s241_s25, 32 }
  0xe1   :  { %p586_p9 = scmp.ne.s32.totalorder %s241_s25, %s585_s29  ;;  %p590_p10 = scmp.lt.s32.totalorder %s241_s25, %s241_s25 }
  0xe2   :  { %p591_p11 = scmp.lt.s32.totalorder %s589_s11, %s585_s29 }
  0xe4   :  { %p592_p12 = por %p591_p11, %p590_p10 }
  0xe6   :  { %p593_p13 = pnand %p592_p12, %p586_p9 }
 0x16c   :  { %v189_v5 = vpop.xlane.xlu0 %188  ;;  %v204_v13 = vpop.xlane.xlu1 %203 }
 0x16d   :  { %v190_v6 = vsub.f32 %v184_v1, %v189_v5 }
 0x16f   :  { %v191_v7 = vmul.f32 1.442695, %v190_v6  ;;  %v198_v8 = vmul.f32 %v190_v6, %v185_v3 }
 0x171   :  { %357 = vpow2.f32 %v191_v7  ;;  %v199_v9 = vsel %vm186_vm1, %v198_v8, 0.0 }
 0x172   :  { %200 = vadd.xlane.f32.xlu1 %v199_v9 }
 0x17b   :  { %v358_v10 = vpop.eup %357 }
 0x17c   :  { %v193_v11 = vsel %vm186_vm1, %v358_v10, 0.0 }
 0x17d   :  { %194 = vadd.xlane.f32.xlu0 %v193_v11 }
 0x1ff   :  { %v201_v17 = vpop.xlane.xlu1 %200 }
 0x20a   :  { %v195_v12 = vpop.xlane.xlu0 %194 }
 0x20b   :  { %359 = vlog2.f32 %v195_v12 }
 0x215   :  { %v360_v14 = vpop.eup %359 }
 0x216   :  { %v197_v15 = vmul.f32 0.6931472, %v360_v14 }
 0x218   :  { %v205_v16 = vmul.f32 %v204_v13, %v197_v15 }
 0x21a   :  { %v206_v18 = vsub.f32 %v201_v17, %v205_v16 }
 0x21c   :  { %v215_v19 = vsel %vm214_vm2, %v206_v18, 0.0 }
 0x21d   :  { %216 = vadd.xlane.f32.xlu0 %v215_v19 }
 0x2aa   :  { %v217_v20 = vpop.xlane.xlu0 %216 }
 0x2ab   :  { %v218_v21 = vrot.slane %v217_v20, 4 }
 0x2ad   :  { %v219_v22 = vadd.f32 %v218_v21, %v217_v20 }
 0x2af   :  { %v220_v23 = vrot.slane %v219_v22, 2 }
 0x2b1   :  { %v221_v24 = vadd.f32 %v220_v23, %v219_v22 }
 0x2b3   :  { %v222_v25 = vrot.slane %v221_v24, 1 }
 0x2b5   :  { %v223_v26 = vadd.f32 %v222_v25, %v221_v24 }
 0x2b7   :  { %343 = vpush %v223_v26 }
 0x2e8   :  { %s344_s2 = spop %343 }
 0x2e9   :  { %v225_v28 = vstv %s344_s2 }
 0x2ea   :  { %v226_v29 = vadd.f32 %v225_v28, %v213_v27 }
 0x2ec   :  { %228 = vst.msk [vmem:[#allocation4] sm:$0x1] %vm32_vm0, %v226_v29 }
 0x2f3   :  { %v229_v30 = vld [vmem:[#allocation4] sm:$0x1] }
 0x2f4   :  { %v230_v31 = vsub.f32 0.0, %v229_v30 }
 0x2f6   :  { %v232_v32 = vmul.f32 0.125, %v230_v31 }
 0x2f8   :  { %233 = vst.msk [vmem:[#allocation10] sm:$0x1] %vm32_vm0, %v232_v32 }
 0x2f9   :  { %596 = shalt.err (!%p593_p13)
}
 0x2fa   :  { %s597_s22 = scalar_lea.hbm %s834_s3, 16 }
 0x2fb   :  { %p598_p0 = scmp.ne.s32.totalorder %s834_s3, %s597_s22  ;;  %p601_p1 = scmp.lt.u32.totalorder %s597_s22, %s834_s3 }
 0x2fd   :  { %p603_p2 = pnand %p601_p1, %p598_p0 }
 0x2ff   :  { %606 = shalt.err (!%p603_p2)
}
 0x300   :  { %243 = dma.vmem_to_hbm [thread:$0]  %s241_s25, 16, %s834_s3, [#allocation9]  }
 0x301   :  { %627 = dma.done.wait [#allocation9], 16  }
 0x302   :  { %628 = vsyncadd [#allocation9], 4294967280 }
 0x303   :  { %247 = vsyncpa [#allocation8], 1 }
 0x304   :  { %248 = vsyncpa [#allocation9], 1 }
 0x305   :  { %249 = vsyncmov [#allocation3] }
 0x308   :  { %s250_s30 = vpop.sfrf %249 }
 0x309   :  { %p335_p3 = scmp.ne.s32.totalorder %s250_s30, 0 }
 0x30b   :  { %254 = shalt.err (%p335_p3)  }
 0x30c   :  { %256 = vsyncmov [#allocation3 + $0x1] }
 0x30f   :  { %s257_s0 = vpop.sfrf %256 }
 0x310   :  { %p336_p4 = scmp.ne.s32.totalorder %s257_s0, 0 }
 0x312   :  { %261 = shalt.err (%p336_p4)  }
 0x313   :  { %263 = vsyncmov [#allocation3 + $0x2] }
 0x316   :  { %s264_s4 = vpop.sfrf %263 }
 0x317   :  { %p337_p5 = scmp.ne.s32.totalorder %s264_s4, 0 }
 0x319   :  { %268 = shalt.err (%p337_p5)  }
 0x31a   :  { %270 = vsyncmov [#allocation3 + $0x3] }
 0x31d   :  { %s271_s6 = vpop.sfrf %270 }
 0x31e   :  { %p338_p6 = scmp.ne.s32.totalorder %s271_s6, 0 }
 0x320   :  { %275 = shalt.err (%p338_p6)  }
 0x321   :  { %277 = vsyncmov [#allocation3 + $0x4] }
 0x324   :  { %s278_s3 = vpop.sfrf %277 }
 0x325   :  { %p339_p7 = scmp.ne.s32.totalorder %s278_s3, 0 }
 0x327   :  { %282 = shalt.err (%p339_p7)  }
 0x328   :  { %284 = vsyncmov [#allocation3 + $0x5] }
 0x32b   :  { %s285_s7 = vpop.sfrf %284 }
 0x32c   :  { %p340_p8 = scmp.ne.s32.totalorder %s285_s7, 0 }
 0x32e   :  { %289 = shalt.err (%p340_p8)  }
 0x32f   :  { %291 = vsyncmov [#allocation3 + $0x6] }
 0x332   :  { %s292_s12 = vpop.sfrf %291 }
 0x333   :  { %p341_p9 = scmp.ne.s32.totalorder %s292_s12, 0 }
 0x335   :  { %296 = shalt.err (%p341_p9)  }
 0x336   :  { %298 = vsyncmov [#allocation3 + $0x7] }
 0x339   :  { %s299_s5 = vpop.sfrf %298 }
 0x33a   :  { %p342_p10 = scmp.ne.s32.totalorder %s299_s5, 0 }
 0x33c   :  { %303 = shalt.err (%p342_p10)  }

</bundles_post_ra>
